<compile_context>
chip_gen: v6e
topology: v6e:2x2x1
jax: 0.10.0
libtpu: 0.0.40
codegen_flags: <defaults>
</compile_context>

<pallas_src>
import functools

import jax
import jax.numpy as jnp
from jax import lax
from jax.experimental import pallas as pl
from jax.experimental.pallas import tpu as pltpu

EPS = 1e-6


def _round_up(x, m):
    return ((x + m - 1) // m) * m


def _device_kind():
    try:
        return jax.devices()[0].device_kind.lower()
    except Exception:
        return ""


def _vmem_limit_bytes(kind):
    # v7x: 64 MiB physical VMEM -> leave headroom; v5e/v6e: 128 MiB physical.
    if "v7" in kind:
        return 48 * 1024 * 1024
    return 96 * 1024 * 1024


def _row_tile_cap(kind):
    # Bigger tiles on 128-MiB-VMEM parts; a bit smaller on v7x.
    if "v7" in kind:
        return 512
    return 1024


def _pick_row_tile(M, cap):
    """Largest multiple-of-8 divisor of M (<= cap) -> no padding, no mask.
    Falls back to padding only when no such divisor exists."""
    best = 0
    for d in range(8, min(M, cap) + 1, 8):
        if M % d == 0:
            best = d
    if best:
        return best, M, False
    TM = max(8, (min(cap, _round_up(M, 8)) // 8) * 8)
    Mp = _round_up(M, TM)
    return TM, Mp, True


# ----------------------------------------------------------------------------
# Fused kernel: for each row tile
#   h = x_tile
#   for l in layers:  h = bf16_matmul(h, W[l]) + b[l];  loss_part += sum(h*h)
#   out_tile = LayerNorm(h)             (unbiased std, std+eps denominator)
# Each grid step writes its own per-tile loss partial (SMEM); the wrapper reduces.
# ----------------------------------------------------------------------------
def _encoder_kernel(x_ref, w_ref, b_ref, alpha_ref, bias_ref,
                    o_ref, loss_ref,
                    *, n_layers, rows_valid, tile_rows, need_mask):
    h = x_ref[...].astype(jnp.float32)

    if need_mask:
        # Only used when M had to be padded: mask padded rows out of the loss.
        i = pl.program_id(0)
        row_ids = lax.broadcasted_iota(jnp.int32, (tile_rows, 1), 0) + i * tile_rows
        mask = (row_ids < rows_valid).astype(jnp.float32)  # (TM, 1)
    else:
        mask = None

    def layer_body(l, carry):
        h, s = carry
        w = w_ref[l]                                   # (D, D) bf16, VMEM resident
        b = b_ref[l]                                   # (1, D) f32
        # bf16 operands (MXU-native), f32 accumulation.
        y = jnp.dot(h.astype(jnp.bfloat16), w,
                    preferred_element_type=jnp.float32) + b
        # Reduce along lanes first (XLU), then mask only the (TM,1) row sums.
        row_sq = jnp.sum(y * y, axis=-1, keepdims=True)
        if mask is not None:
            row_sq = row_sq * mask
        return y, s + jnp.sum(row_sq)

    h, tile_loss = lax.fori_loop(0, n_layers, layer_body,
                                 (h, jnp.float32(0.0)),
                                 unroll=(n_layers <= 8))

    loss_ref[0, 0] = tile_loss                          # per-tile partial sum

    # ---- LayerNormalization epilogue (unbiased std, std + eps denominator) ----
    d = h.shape[-1]
    mean = jnp.mean(h, axis=-1, keepdims=True)
    diff = h - mean
    var = jnp.sum(diff * diff, axis=-1, keepdims=True) * jnp.float32(1.0 / (d - 1))
    inv = pl.reciprocal(jnp.sqrt(var) + jnp.float32(EPS), approx=False)
    o_ref[...] = (alpha_ref[...] * diff * inv + bias_ref[...]).astype(o_ref.dtype)


# ----------------------------------------------------------------------------
# Wrapper: flatten to (M, D), pick a divisor row tile (pad only if unavoidable),
# one pallas_call, reduce per-tile loss partials outside.
# ----------------------------------------------------------------------------
@jax.jit
def encoder_forward(x, w_stack, b_stack, alpha, bias):
    B, S, D = x.shape
    L = w_stack.shape[0]
    M = B * S

    kind = _device_kind()
    TM, Mp, need_pad = _pick_row_tile(M, _row_tile_cap(kind))
    n_tiles = Mp // TM

    h = x.reshape(M, D).astype(jnp.float32)
    if need_pad:
        h = jnp.pad(h, ((0, Mp - M), (0, 0)))

    # bf16 weights: MXU-native operands + half the resident VMEM footprint.
    w_bf16 = w_stack.astype(jnp.bfloat16)          # (L, D, D)
    b_f32 = b_stack.astype(jnp.float32)            # (L, 1, D)

    kernel = functools.partial(
        _encoder_kernel,
        n_layers=L, rows_valid=M, tile_rows=TM, need_mask=need_pad,
    )

    cost = pl.CostEstimate(
        flops=2 * L * Mp * D * D + 12 * Mp * D,
        transcendentals=2 * Mp,                     # sqrt + reciprocal per row
        bytes_accessed=(2 * Mp * D + L * D + 2 * D) * 4 + L * D * D * 2,
    )

    out, loss_parts = pl.pallas_call(
        kernel,
        out_shape=(
            jax.ShapeDtypeStruct((Mp, D), jnp.float32),
            jax.ShapeDtypeStruct((n_tiles, 1), jnp.float32),
        ),
        grid=(n_tiles,),
        in_specs=[
            pl.BlockSpec((TM, D), lambda i: (i, 0)),        # x tile (pipelined)
            pl.BlockSpec(memory_space=pltpu.VMEM),          # weights: one resident copy
            pl.BlockSpec(memory_space=pltpu.VMEM),          # biases
            pl.BlockSpec(memory_space=pltpu.VMEM),          # LN alpha (1, D)
            pl.BlockSpec(memory_space=pltpu.VMEM),          # LN bias  (1, D)
        ],
        out_specs=(
            pl.BlockSpec((TM, D), lambda i: (i, 0)),        # normalized output tile
            pl.BlockSpec((1, 1), lambda i: (i, 0),          # per-tile loss partial
                         memory_space=pltpu.SMEM),
        ),
        compiler_params=pltpu.CompilerParams(
            # Per-tile partial losses -> no cross-step state -> fully parallel grid
            # (2-TC sharding on v7x; no-op on single-TC v5e/v6e).
            dimension_semantics=("parallel",),
            vmem_limit_bytes=_vmem_limit_bytes(kind),
        ),
        cost_estimate=cost,
    )(h, w_bf16, b_f32, alpha.reshape(1, D), bias.reshape(1, D))

    loss = jnp.sum(loss_parts) * jnp.float32(1.0 / (M * D))
    if need_pad:
        out = out[:M]
    return out.reshape(B, S, D), loss


if __name__ == "__main__":
    batch, seq, d_model, n_layers = 2, 8, 32, 2

    key = jax.random.PRNGKey(0)
    kx, *kws = jax.random.split(key, 1 + n_layers)
    x = jax.random.normal(kx, (batch, seq, d_model), dtype=jnp.float32)

    # Deterministic synthetic layer parameters, stacked for the fused kernel.
    layer_ws = jnp.stack([
        jax.random.normal(kws[i], (d_model, d_model), dtype=jnp.float32)
        * (1.0 / jnp.sqrt(d_model))
        for i in range(n_layers)
    ])                                                  # (L, D, D)
    layer_bs = jnp.zeros((n_layers, 1, d_model), jnp.float32)   # (L, 1, D)
    # LayerNormalization params: alpha=ones, bias=zeros (as in __init__)
    alpha = jnp.ones((d_model,), jnp.float32)
    bias = jnp.zeros((d_model,), jnp.float32)

    out, loss = encoder_forward(x, layer_ws, layer_bs, alpha, bias)
    out, loss = jax.block_until_ready((out, loss))

    # Pure-JAX references.
    def reference(use_bf16_matmul):
        h = x.reshape(batch * seq, d_model)
        total = jnp.float32(0.0)
        for l in range(n_layers):
            if use_bf16_matmul:
                h = jnp.dot(h.astype(jnp.bfloat16),
                            layer_ws[l].astype(jnp.bfloat16),
                            preferred_element_type=jnp.float32) + layer_bs[l]
            else:
                h = h @ layer_ws[l] + layer_bs[l]
            total = total + jnp.mean(h * h)
        mean = h.mean(-1, keepdims=True)
        std = jnp.sqrt(((h - mean) ** 2).sum(-1, keepdims=True) / (d_model - 1))
        o = (alpha * (h - mean) / (std + EPS) + bias).reshape(batch, seq, d_model)
        return o, total

    # Tight check against a reference using the SAME matmul precision as the kernel.
    out_bf, loss_bf = reference(True)
    assert jnp.allclose(out, out_bf, atol=1e-4, rtol=1e-4)
    assert jnp.allclose(loss, loss_bf, atol=1e-4, rtol=1e-4)
    # Loose sanity check against the exact-f32 PyTorch-equivalent math
    # (difference is only bf16 MXU operand rounding).
    out_f32, loss_f32 = reference(False)
    assert jnp.allclose(out, out_f32, atol=5e-2, rtol=5e-2)
    assert jnp.allclose(loss, loss_f32, atol=5e-2, rtol=5e-2)
    print("KERNEL_OK")
</pallas_src>

<mosaic_0001>
module attributes {stable_mosaic.version = 11 : i64} {
  func.func @_encoder_kernel(%arg0: i32, %arg1: memref<16x32xf32, #tpu.memory_space<vmem>>, %arg2: memref<2x32x32xbf16, #tpu.memory_space<vmem>>, %arg3: memref<2x1x32xf32, #tpu.memory_space<vmem>>, %arg4: memref<1x32xf32, #tpu.memory_space<vmem>>, %arg5: memref<1x32xf32, #tpu.memory_space<vmem>>, %arg6: memref<16x32xf32, #tpu.memory_space<vmem>>, %arg7: memref<1x1xf32, #tpu.memory_space<smem>>) attributes {dimension_semantics = [#tpu.dimension_semantics<parallel>], iteration_bounds = array<i64: 1>, scalar_prefetch = 0 : i64, scratch_operands = 0 : i64, tpu.core_type = #tpu.core_type<tc>, window_params = [{transform_indices = @transform_0, window_bounds = array<i64: 16, 32>}, {pipeline_mode = #tpu.pipeline_mode<synchronous>, transform_indices = @transform_1, window_bounds = array<i64: 2, 32, 32>}, {pipeline_mode = #tpu.pipeline_mode<synchronous>, transform_indices = @transform_2, window_bounds = array<i64: 2, 1, 32>}, {pipeline_mode = #tpu.pipeline_mode<synchronous>, transform_indices = @transform_3, window_bounds = array<i64: 1, 32>}, {pipeline_mode = #tpu.pipeline_mode<synchronous>, transform_indices = @transform_4, window_bounds = array<i64: 1, 32>}, {transform_indices = @transform_5, window_bounds = array<i64: 16, 32>}, {transform_indices = @transform_6, window_bounds = array<i64: 1, 1>}]} {
    %c0 = arith.constant 0 : index
    %c0_0 = arith.constant 0 : index
    %0 = vector.load %arg1[%c0, %c0_0] : memref<16x32xf32, #tpu.memory_space<vmem>>, vector<16x32xf32>
    %cst = arith.constant 0.000000e+00 : f32
    %c0_i32 = arith.constant 0 : i32
    %1 = arith.index_cast %c0_i32 : i32 to index
    %c0_1 = arith.constant 0 : index
    %c0_2 = arith.constant 0 : index
    %2 = vector.load %arg2[%1, %c0_1, %c0_2] : memref<2x32x32xbf16, #tpu.memory_space<vmem>>, vector<1x32x32xbf16>
    %3 = vector.shape_cast %2 : vector<1x32x32xbf16> to vector<32x32xbf16>
    %4 = arith.index_cast %c0_i32 : i32 to index
    %c0_3 = arith.constant 0 : index
    %c0_4 = arith.constant 0 : index
    %5 = vector.load %arg3[%4, %c0_3, %c0_4] : memref<2x1x32xf32, #tpu.memory_space<vmem>>, vector<1x1x32xf32>
    %6 = vector.shape_cast %5 : vector<1x1x32xf32> to vector<1x32xf32>
    %7 = arith.truncf %0 : vector<16x32xf32> to vector<16x32xbf16>
    %cst_5 = arith.constant dense<0.000000e+00> : vector<16x32xf32>
    %8 = tpu.matmul %7, %3, %cst_5 {dimension_numbers = #tpu.dot_dimension_numbers<[1], [0], [0], [1], [0, 0, 1, 1], [], []>} : vector<16x32xbf16>, vector<32x32xbf16>, vector<16x32xf32> -> vector<16x32xf32>
    %9 = vector.broadcast %6 : vector<1x32xf32> to vector<16x32xf32>
    %10 = arith.addf %8, %9 : vector<16x32xf32>
    %11 = arith.mulf %10, %10 : vector<16x32xf32>
    %cst_6 = arith.constant dense<0.000000e+00> : vector<16xf32>
    %12 = vector.multi_reduction <add>, %11, %cst_6 [1] : vector<16x32xf32> to vector<16xf32>
    %13 = vector.shape_cast %12 : vector<16xf32> to vector<16x1xf32>
    %14 = vector.shape_cast %13 : vector<16x1xf32> to vector<1x16x1xf32>
    %cst_7 = arith.constant dense<0.000000e+00> : vector<1xf32>
    %15 = vector.multi_reduction <add>, %14, %cst_7 [1, 2] : vector<1x16x1xf32> to vector<1xf32>
    %16 = vector.shape_cast %15 : vector<1xf32> to vector<1x1x1xf32>
    %17 = vector.extract %16[0, 0, 0] : f32 from vector<1x1x1xf32>
    %18 = arith.addf %cst, %17 : f32
    %c1_i32 = arith.constant 1 : i32
    %19 = arith.index_cast %c1_i32 : i32 to index
    %c0_8 = arith.constant 0 : index
    %c0_9 = arith.constant 0 : index
    %20 = vector.load %arg2[%19, %c0_8, %c0_9] : memref<2x32x32xbf16, #tpu.memory_space<vmem>>, vector<1x32x32xbf16>
    %21 = vector.shape_cast %20 : vector<1x32x32xbf16> to vector<32x32xbf16>
    %22 = arith.index_cast %c1_i32 : i32 to index
    %c0_10 = arith.constant 0 : index
    %c0_11 = arith.constant 0 : index
    %23 = vector.load %arg3[%22, %c0_10, %c0_11] : memref<2x1x32xf32, #tpu.memory_space<vmem>>, vector<1x1x32xf32>
    %24 = vector.shape_cast %23 : vector<1x1x32xf32> to vector<1x32xf32>
    %25 = arith.truncf %10 : vector<16x32xf32> to vector<16x32xbf16>
    %cst_12 = arith.constant dense<0.000000e+00> : vector<16x32xf32>
    %26 = tpu.matmul %25, %21, %cst_12 {dimension_numbers = #tpu.dot_dimension_numbers<[1], [0], [0], [1], [0, 0, 1, 1], [], []>} : vector<16x32xbf16>, vector<32x32xbf16>, vector<16x32xf32> -> vector<16x32xf32>
    %27 = vector.broadcast %24 : vector<1x32xf32> to vector<16x32xf32>
    %28 = arith.addf %26, %27 : vector<16x32xf32>
    %29 = arith.mulf %28, %28 : vector<16x32xf32>
    %cst_13 = arith.constant dense<0.000000e+00> : vector<16xf32>
    %30 = vector.multi_reduction <add>, %29, %cst_13 [1] : vector<16x32xf32> to vector<16xf32>
    %31 = vector.shape_cast %30 : vector<16xf32> to vector<16x1xf32>
    %32 = vector.shape_cast %31 : vector<16x1xf32> to vector<1x16x1xf32>
    %cst_14 = arith.constant dense<0.000000e+00> : vector<1xf32>
    %33 = vector.multi_reduction <add>, %32, %cst_14 [1, 2] : vector<1x16x1xf32> to vector<1xf32>
    %34 = vector.shape_cast %33 : vector<1xf32> to vector<1x1x1xf32>
    %35 = vector.extract %34[0, 0, 0] : f32 from vector<1x1x1xf32>
    %36 = arith.addf %18, %35 : f32
    %c2_i32 = arith.constant 2 : i32
    %c0_15 = arith.constant 0 : index
    %c0_16 = arith.constant 0 : index
    %37 = memref.load %arg7[%c0_15, %c0_16] : memref<1x1xf32, #tpu.memory_space<smem>>
    memref.store %36, %arg7[%c0_15, %c0_16] : memref<1x1xf32, #tpu.memory_space<smem>>
    %cst_17 = arith.constant dense<0.000000e+00> : vector<16xf32>
    %38 = vector.multi_reduction <add>, %28, %cst_17 [1] : vector<16x32xf32> to vector<16xf32>
    %39 = vector.shape_cast %38 : vector<16xf32> to vector<16x1xf32>
    %cst_18 = arith.constant 3.200000e+01 : f32
    %40 = vector.broadcast %cst_18 : f32 to vector<16x1xf32>
    %41 = arith.divf %39, %40 : vector<16x1xf32>
    %42 = vector.broadcast %41 : vector<16x1xf32> to vector<16x32xf32>
    %43 = arith.subf %28, %42 : vector<16x32xf32>
    %44 = arith.mulf %43, %43 : vector<16x32xf32>
    %cst_19 = arith.constant dense<0.000000e+00> : vector<16xf32>
    %45 = vector.multi_reduction <add>, %44, %cst_19 [1] : vector<16x32xf32> to vector<16xf32>
    %46 = vector.shape_cast %45 : vector<16xf32> to vector<16x1xf32>
    %cst_20 = arith.constant 0.0322580636 : f32
    %47 = vector.broadcast %cst_20 : f32 to vector<16x1xf32>
    %48 = arith.mulf %46, %47 : vector<16x1xf32>
    %49 = math.sqrt %48 : vector<16x1xf32>
    %cst_21 = arith.constant 9.99999997E-7 : f32
    %50 = vector.broadcast %cst_21 : f32 to vector<16x1xf32>
    %51 = arith.addf %49, %50 : vector<16x1xf32>
    %52 = tpu.reciprocal %51 : vector<16x1xf32> -> vector<16x1xf32>
    %c0_22 = arith.constant 0 : index
    %c0_23 = arith.constant 0 : index
    %53 = vector.load %arg4[%c0_22, %c0_23] : memref<1x32xf32, #tpu.memory_space<vmem>>, vector<1x32xf32>
    %54 = vector.broadcast %53 : vector<1x32xf32> to vector<16x32xf32>
    %55 = arith.mulf %54, %43 : vector<16x32xf32>
    %56 = vector.broadcast %52 : vector<16x1xf32> to vector<16x32xf32>
    %57 = arith.mulf %55, %56 : vector<16x32xf32>
    %c0_24 = arith.constant 0 : index
    %c0_25 = arith.constant 0 : index
    %58 = vector.load %arg5[%c0_24, %c0_25] : memref<1x32xf32, #tpu.memory_space<vmem>>, vector<1x32xf32>
    %59 = vector.broadcast %58 : vector<1x32xf32> to vector<16x32xf32>
    %60 = arith.addf %57, %59 : vector<16x32xf32>
    %c0_26 = arith.constant 0 : index
    %c0_27 = arith.constant 0 : index
    %61 = vector.load %arg6[%c0_26, %c0_27] : memref<16x32xf32, #tpu.memory_space<vmem>>, vector<16x32xf32>
    tpu.vector_store %arg6[%c0_26, %c0_27], %60 {strides = array<i32>} : memref<16x32xf32, #tpu.memory_space<vmem>>, vector<16x32xf32>,
    return
  }
  func.func @transform_0(%arg0: i32) -> (i32, i32) {
    %c0_i32 = arith.constant 0 : i32
    %c0_i32_0 = arith.constant 0 : i32
    return %arg0, %c0_i32 : i32, i32
  }
  func.func @transform_1(%arg0: i32) -> (i32, i32, i32) {
    %c0_i32 = arith.constant 0 : i32
    %c0_i32_0 = arith.constant 0 : i32
    %c0_i32_1 = arith.constant 0 : i32
    %c0_i32_2 = arith.constant 0 : i32
    return %c0_i32, %c0_i32_0, %c0_i32_1 : i32, i32, i32
  }
  func.func @transform_2(%arg0: i32) -> (i32, i32, i32) {
    %c0_i32 = arith.constant 0 : i32
    %c0_i32_0 = arith.constant 0 : i32
    %c0_i32_1 = arith.constant 0 : i32
    %c0_i32_2 = arith.constant 0 : i32
    return %c0_i32, %c0_i32_0, %c0_i32_1 : i32, i32, i32
  }
  func.func @transform_3(%arg0: i32) -> (i32, i32) {
    %c0_i32 = arith.constant 0 : i32
    %c0_i32_0 = arith.constant 0 : i32
    %c0_i32_1 = arith.constant 0 : i32
    return %c0_i32, %c0_i32_0 : i32, i32
  }
  func.func @transform_4(%arg0: i32) -> (i32, i32) {
    %c0_i32 = arith.constant 0 : i32
    %c0_i32_0 = arith.constant 0 : i32
    %c0_i32_1 = arith.constant 0 : i32
    return %c0_i32, %c0_i32_0 : i32, i32
  }
  func.func @transform_5(%arg0: i32) -> (i32, i32) {
    %c0_i32 = arith.constant 0 : i32
    %c0_i32_0 = arith.constant 0 : i32
    return %arg0, %c0_i32 : i32, i32
  }
  func.func @transform_6(%arg0: i32) -> (i32, i32) {
    %c0_i32 = arith.constant 0 : i32
    %c0_i32_0 = arith.constant 0 : i32
    return %arg0, %c0_i32 : i32, i32
  }
}

</mosaic_0001>

<bundles_post_ra>
// kernel: encoder_forward.1
= control target key start
LH: loop header
LB: loop body
LE: loop exit
PB: predicated region body
PF: predicated region fallthrough
CT: control target
= control target key end

     0   :  { %12 = vsyncpa [#allocation3], 0  ;;  %v392_v1 = vmov 0.0   ;;  %vm393_vm0 = vmmov 0   ;;  %s485_s0 = inlined_call_operand.vmem [shape: f32[16,32], index: 0, kind: input, shape index: {}]   ;;  %s486_s1 = inlined_call_operand.vmem [shape: bf16[2,32,32], index: 1, kind: input, shape index: {}]   ;;  %s487_s2 = inlined_call_operand.vmem [shape: f32[2,1,32], index: 2, kind: input, shape index: {}]   ;;  %s488_s3 = inlined_call_operand.vmem [shape: f32[1,32], index: 3, kind: input, shape index: {}]   ;;  %s489_s4 = inlined_call_operand.vmem [shape: f32[1,32], index: 4, kind: input, shape index: {}]   ;;  %s490_s5 = inlined_call_operand.hbm [shape: f32[16,32], index: 5, kind: output, shape index: {0}]   ;;  %s491_s6 = inlined_call_operand.hbm [shape: f32[1,1], index: 6, kind: output, shape index: {1}]  }
   0x1   :  { %v348_v0 = vld [vmem:[%s486_s1 + $0x8] sm:$0xff]   ;;  %322 = vmatprep.subr.bf16.mxu0 %v392_v1  ;;  %330 = vmatprep.subr.bf16.mxu1 %v392_v1  ;;  %v349_v2 = vld [vmem:[%s486_s1] sm:$0xff]  }
   0x2   :  { %323 = vmatpush3.bf16.msra.mxu0 %v348_v0  ;;  %326 = vmatprep.mubr.msk.bf16.mxu0 %vm393_vm0, %v392_v1  ;;  %v25_v3 = vld [vmem:[%s485_s0] sm:$0xff]  ;;  %v26_v4 = vld [vmem:[%s485_s0 + $0x8] sm:$0xff] }
   0x3   :  { %324 = vmatprep.subr.bf16.mxu0 %v392_v1  ;;  %334 = vmatprep.mubr.msk.bf16.mxu1 %vm393_vm0, %v392_v1 }
   0x4   :  { %13 = vsyncpa [#allocation4], 0  ;;  %v32_v5 = vpack.c.bf16 %v26_v4, %v25_v3  ;;  %vm51_vm1 = vcmask 261120   ;;  %v350_v6 = vld [vmem:[%s486_s1 + $0x18] sm:$0xff]   ;;  %v351_v7 = vld [vmem:[%s486_s1 + $0x10] sm:$0xff]   ;;  %vm104_vm2 = vcmask 7168  }
   0x5   :  { %331 = vmatpush3.bf16.msra.mxu1 %v350_v6  ;;  %v301_v8 = vld [vmem:[%s487_s2] ss:$0 sm:$0xff]  ;;  %v310_v21 = vld [vmem:[%s487_s2 + $0x1] ss:$0 sm:$0xff]  ;;  %s394_s14 = smov [#allocation2]  }
   0x6   :  { %325 = vmatpush3.bf16.msra.mxu0 %v349_v2  ;;  %332 = vmatprep.subr.bf16.mxu1 %v392_v1  ;;  %s277_s15 = sshll.u32 %s394_s14, 4  ;;  %s278_s15 = int_to_ptr.vmem [resolvable:$true] %s277_s15 }
   0x7   :  { %p365_p1 = scmp.lt.s32.totalorder %s278_s15, %s278_s15 }
   0x9   :  { %327 = vmatmul.mubr.msk.bf16.vlgmr.msra.gmra.mxu0 %vm51_vm1, %v32_v5  ;;  %333 = vmatpush3.bf16.msra.mxu1 %v351_v7 }
  0xc9   :  { %v89_v9 = vpop.f32.mrf.mxu0 }
  0xca   :  { %v90_v10 = vadd.f32 %v301_v8, %v89_v9 }
  0xcb   :  { %v328_v11 = vpop.f32.mrf.mxu0 }
  0xcc   :  { %v96_v12 = vmul.f32 %v90_v10, %v90_v10 }
  0xcd   :  { %v92_v13 = vpop.f32.mrf.mxu0 }
  0xce   :  { %v93_v14 = vadd.f32 %v301_v8, %v92_v13  ;;  %v98_v15 = vsel %vm51_vm1, %v96_v12, 0.0 }
  0xcf   :  { %99 = vadd.xlane.f32.xlu0 %v98_v15  ;;  %v329_v16 = vpop.f32.mrf.mxu0 }
  0xd0   :  { %v125_v17 = vpack.c.bf16 %v93_v14, %v90_v10  ;;  %v97_v18 = vmul.f32 %v93_v14, %v93_v14 }
  0xd2   :  { %335 = vmatmul.mubr.msk.bf16.vlgmr.msra.gmra.mxu1 %vm51_vm1, %v125_v17  ;;  %v101_v19 = vsel %vm51_vm1, %v97_v18, 0.0 }
  0xd3   :  { %102 = vadd.xlane.f32.xlu0 %v101_v19  ;;  %v314_v19 = vld [vmem:[%s488_s3] ss:$0 sm:$0xff]  ;;  %s360_s3 = scalar_lea.vmem %s278_s15, 256 }
  0xd4   :  { %p361_p0 = scmp.ne.s32.totalorder %s278_s15, %s360_s3  ;;  %p366_p2 = scmp.lt.s32.totalorder %s360_s3, %s360_s3 }
  0xd6   :  { %p367_p3 = por %p366_p2, %p365_p1 }
  0xd8   :  { %p368_p4 = pnand %p367_p3, %p361_p0 }
 0x158   :  { %v100_v20 = vpop.xlane.xlu0 %99 }
 0x159   :  { %v105_v30 = vsel %vm104_vm2, %v100_v20, 0.0 }
 0x15c   :  { %v103_v22 = vpop.xlane.xlu0 %102 }
 0x15d   :  { %v106_v26 = vsel %vm104_vm2, %v103_v22, 0.0  ;;  %v315_v22 = vld [vmem:[%s489_s4] ss:$0 sm:$0xff] }
 0x15e   :  { %v107_v34 = vadd.f32 %v106_v26, %v105_v30 }
 0x192   :  { %v181_v23 = vpop.f32.mrf.mxu1 }
 0x193   :  { %v182_v24 = vadd.f32 %v310_v21, %v181_v23 }
 0x194   :  { %v336_v25 = vpop.f32.mrf.mxu1 }
 0x195   :  { %v211_v27 = vsel %vm51_vm1, %v182_v24, 0.0  ;;  %v188_v28 = vmul.f32 %v182_v24, %v182_v24 }
 0x196   :  { %v184_v29 = vpop.f32.mrf.mxu1  ;;  %212 = vadd.xlane.f32.xlu0 %v211_v27 }
 0x197   :  { %v185_v31 = vadd.f32 %v310_v21, %v184_v29  ;;  %v190_v32 = vsel %vm51_vm1, %v188_v28, 0.0 }
 0x198   :  { %191 = vadd.xlane.f32.xlu1 %v190_v32  ;;  %v337_v33 = vpop.f32.mrf.mxu1 }
 0x199   :  { %v189_v35 = vmul.f32 %v185_v31, %v185_v31  ;;  %v214_v37 = vsel %vm51_vm1, %v185_v31, 0.0 }
 0x19a   :  { %108 = vadd.xlane.f32.xlu0 %v107_v34 }
 0x19b   :  { %v193_v36 = vsel %vm51_vm1, %v189_v35, 0.0 }
 0x19c   :  { %194 = vadd.xlane.f32.xlu1 %v193_v36 }
 0x1a0   :  { %215 = vadd.xlane.f32.xlu1 %v214_v37 }
 0x21f   :  { %v213_v38 = vpop.xlane.xlu0 %212 }
 0x220   :  { %v218_v39 = vmul.f32 0.03125, %v213_v38 }
 0x221   :  { %v192_v40 = vpop.xlane.xlu1 %191 }
 0x222   :  { %v220_v41 = vsub.f32 %v182_v24, %v218_v39  ;;  %v196_v46 = vsel %vm104_vm2, %v192_v40, 0.0 }
 0x223   :  { %v109_v42 = vpop.xlane.xlu0 %108 }
 0x224   :  { %v110_v43 = vrot.slane %v109_v42, 4  ;;  %v222_v44 = vmul.f32 %v220_v41, %v220_v41  ;;  %v257_v20 = vmul.f32 %v314_v19, %v220_v41 }
 0x225   :  { %v195_v45 = vpop.xlane.xlu1 %194 }
 0x226   :  { %v111_v47 = vadd.f32 %v110_v43, %v109_v42  ;;  %v197_v48 = vsel %vm104_vm2, %v195_v45, 0.0  ;;  %v224_v49 = vsel %vm51_vm1, %v222_v44, 0.0 }
 0x227   :  { %225 = vadd.xlane.f32.xlu0 %v224_v49  ;;  %v198_v50 = vadd.f32 %v197_v48, %v196_v46 }
 0x228   :  { %v112_v51 = vrot.slane %v111_v47, 2 }
 0x229   :  { %199 = vadd.xlane.f32.xlu1 %v198_v50  ;;  %v216_v52 = vpop.xlane.xlu1 %215 }
 0x22a   :  { %v219_v53 = vmul.f32 0.03125, %v216_v52  ;;  %v113_v54 = vadd.f32 %v112_v51, %v111_v47 }
 0x22c   :  { %v221_v55 = vsub.f32 %v185_v31, %v219_v53  ;;  %v114_v56 = vrot.slane %v113_v54, 1 }
 0x22e   :  { %v115_v57 = vadd.f32 %v114_v56, %v113_v54  ;;  %v223_v58 = vmul.f32 %v221_v55, %v221_v55  ;;  %v258_v25 = vmul.f32 %v314_v19, %v221_v55 }
 0x230   :  { %338 = vpush %v115_v57  ;;  %v227_v59 = vsel %vm51_vm1, %v223_v58, 0.0 }
 0x231   :  { %228 = vadd.xlane.f32.xlu1 %v227_v59 }
 0x2b0   :  { %v226_v60 = vpop.xlane.xlu0 %225 }
 0x2b1   :  { %v230_v61 = vmul.f32 0.032258064, %v226_v60 }
 0x2b2   :  { %v200_v62 = vpop.xlane.xlu1 %199 }
 0x2b3   :  { %352 = vrsqrt.f32 %v230_v61  ;;  %v201_v63 = vrot.slane %v200_v62, 4  ;;  %vm234_vm3 = vcmp.eq.f32.partialorder %v230_v61, inf  ;;  %v237_v9 = vand.u32 2147483648, %v230_v61 }
 0x2b4   :  { %vm236_vm4 = vcmp.eq.f32.partialorder %v230_v61, 0.0 }
 0x2b5   :  { %v202_v0 = vadd.f32 %v201_v63, %v200_v62 }
 0x2b7   :  { %v203_v1 = vrot.slane %v202_v0, 2 }
 0x2b9   :  { %v204_v3 = vadd.f32 %v203_v1, %v202_v0 }
 0x2ba   :  { %v229_v2 = vpop.xlane.xlu1 %228 }
 0x2bb   :  { %v231_v4 = vmul.f32 0.032258064, %v229_v2  ;;  %v205_v5 = vrot.slane %v204_v3, 1 }
 0x2bd   :  { %354 = vrsqrt.f32 %v231_v4  ;;  %v206_v6 = vadd.f32 %v205_v5, %v204_v3  ;;  %vm241_vm5 = vcmp.eq.f32.partialorder %v231_v4, inf  ;;  %v244_v15 = vand.u32 2147483648, %v231_v4 }
 0x2be   :  { %vm243_vm6 = vcmp.eq.f32.partialorder %v231_v4, 0.0 }
 0x2bf   :  { %340 = vpush %v206_v6 }
 0x2c0   :  { %v353_v7 = vpop.eup %352 }
 0x2c1   :  { %v233_v8 = vmul.f32 %v353_v7, %v230_v61 }
 0x2c3   :  { %v235_v10 = vsel %vm234_vm3, %v230_v61, %v233_v8 }
 0x2c4   :  { %v238_v11 = vsel %vm236_vm4, %v237_v9, %v235_v10 }
 0x2c5   :  { %v246_v12 = vadd.f32 1e-06, %v238_v11 }
 0x2c7   :  { %356 = vrcp.f32 %v246_v12 }
 0x2ca   :  { %v355_v13 = vpop.eup %354 }
 0x2cb   :  { %v240_v14 = vmul.f32 %v355_v13, %v231_v4 }
 0x2cd   :  { %v242_v16 = vsel %vm241_vm5, %v231_v4, %v240_v14 }
 0x2ce   :  { %v245_v17 = vsel %vm243_vm6, %v244_v15, %v242_v16 }
 0x2cf   :  { %v247_v18 = vadd.f32 1e-06, %v245_v17 }
 0x2d1   :  { %358 = vrcp.f32 %v247_v18 }
 0x2d4   :  { %v357_v21 = vpop.eup %356 }
 0x2d5   :  { %v259_v23 = vmul.f32 %v357_v21, %v257_v20 }
 0x2d7   :  { %v268_v24 = vadd.f32 %v315_v22, %v259_v23 }
 0x2d9   :  { %270 = vst.msk [vmem:[#allocation2] sm:$0xff] %vm51_vm1, %v268_v24 }
 0x2de   :  { %v359_v26 = vpop.eup %358 }
 0x2df   :  { %v260_v27 = vmul.f32 %v359_v26, %v258_v25 }
 0x2e1   :  { %v269_v28 = vadd.f32 %v315_v22, %v260_v27 }
 0x2e3   :  { %271 = vst.msk [vmem:[#allocation2 + $0x8] sm:$0xff] %vm51_vm1, %v269_v28 }
 0x2e4   :  { %371 = shalt.err (!%p368_p4)
}
 0x2e5   :  { %s395_s4 = smov 128   ;;  %s396_s16 = smov 8  }
 0x2e6   :  { %283 = dma.vmem_to_hbm [thread:$0]  %s278_s15, 256, %s490_s5, [#allocation3], %s395_s4, %s395_s4, %s396_s16  }
 0x2e7   :  { %s339_s19 = spop %338  ;;  %s397_s22 = smov [#allocation5]  }
 0x2f0   :  { %s341_s20 = spop %340 }
 0x2f1   :  { %s208_s21 = sadd.f32 %s341_s20, %s339_s19 }
 0x2f3   :  { %210 = sst [smem:[#allocation5]] %s208_s21 }
 0x2f4   :  { %291 = dma.smem_to_hbm %s397_s22, 16, %s491_s6, [#allocation4]  }
 0x2f5   :  { %388 = dma.done.wait [#allocation3], 256  }
 0x2f6   :  { %389 = vsyncadd [#allocation3], 4294967040 }
 0x2f7   :  { %390 = dma.done.wait [#allocation4], 16  }
 0x2f8   :  { %391 = vsyncadd [#allocation4], 4294967280 }
 0x2f9   :  { %298 = sfence }
 0x2fa   :  { %299 = vsyncpa [#allocation3], 1 }
 0x2fb   :  { %300 = vsyncpa [#allocation4], 1 }

</bundles_post_ra>
